<compile_context>
chip_gen: v7x
topology: tpu7x:2x2x1
jax: 0.10.0
libtpu: 0.0.40
codegen_flags: <defaults>
</compile_context>

<pallas_src>
import jax
import jax.numpy as jnp
from jax.experimental import pallas as pl
from jax.experimental.pallas import tpu as pltpu


def identity_map(x: jax.Array, *args, **kwargs) -> jax.Array:
    """IdentityMap.forward(x) -> x.  A true no-op (no kernel, no HBM traffic)."""
    return x


def identity_map_config():
    """Mirrors the PyTorch `config` property (plain Python metadata, no compute)."""
    return {"mm_projector_type": "identity"}


# Only chunk (to overlap multiple in-flight DMAs) when there is enough data to
# amortize the extra DMA-issue cost.
_CHUNK_THRESHOLD_BYTES = 2 * 1024 * 1024
_MAX_CHUNKS = 4


def _chunk_bounds(n_rows: int, n_chunks: int):
    """Static (start, size) pairs splitting [0, n_rows) into <= n_chunks pieces."""
    base, rem = divmod(n_rows, n_chunks)
    bounds, start = [], 0
    for c in range(n_chunks):
        size = base + (1 if c < rem else 0)
        if size > 0:
            bounds.append((start, size))
            start += size
    return bounds


def _make_hbm_copy_kernel(chunks):
    """Kernel: direct HBM->HBM DMA of the whole array, in len(chunks) pieces."""
    n_chunks = len(chunks)

    def kernel(x_hbm, o_hbm, sems):
        copies = []
        if n_chunks == 1:
            cp = pltpu.make_async_copy(x_hbm, o_hbm, sems.at[0])
            cp.start()
            copies.append(cp)
        else:
            for c, (start, size) in enumerate(chunks):
                cp = pltpu.make_async_copy(
                    x_hbm.at[pl.ds(start, size)],
                    o_hbm.at[pl.ds(start, size)],
                    sems.at[c],
                )
                cp.start()  # overlap: issue every chunk before waiting
                copies.append(cp)
        for cp in copies:
            cp.wait()

    return kernel


def identity_copy(x: jax.Array) -> jax.Array:
    """Identity as a materialized Pallas copy (direct HBM->HBM DMA, no VMEM staging)."""
    if x.ndim == 0 or x.size == 0:
        # Nothing to DMA-tile; the forward semantics are identity anyway.
        return x

    nbytes = x.size * jnp.dtype(x.dtype).itemsize
    lead = x.shape[0]

    if nbytes >= _CHUNK_THRESHOLD_BYTES and lead >= 2:
        n_chunks = min(_MAX_CHUNKS, lead)
    else:
        n_chunks = 1
    chunks = _chunk_bounds(lead, n_chunks)

    return pl.pallas_call(
        _make_hbm_copy_kernel(chunks),
        out_shape=jax.ShapeDtypeStruct(x.shape, x.dtype),
        # Raw HBM refs on both sides: no auto-DMA, no VMEM blocks, no grid.
        in_specs=[pl.BlockSpec(memory_space=pl.ANY)],
        out_specs=pl.BlockSpec(memory_space=pl.ANY),
        scratch_shapes=[pltpu.SemaphoreType.DMA((len(chunks),))],
        cost_estimate=pl.CostEstimate(
            flops=0, transcendentals=0, bytes_accessed=2 * nbytes
        ),
    )(x)


if __name__ == "__main__":
    key = jax.random.PRNGKey(0)

    # 1) Small projector-style input [batch, seq, hidden]: exercises the
    #    single-DMA path.
    B, S, H = 2, 8, 32
    x = jax.random.normal(key, (B, S, H), dtype=jnp.float32)
    x_host = jax.device_get(x)

    # The actual forward semantics: a true no-op.
    y0 = identity_map(x)
    jax.block_until_ready(y0)
    assert y0.shape == (B, S, H) and y0.dtype == jnp.float32
    assert jnp.array_equal(y0, x)

    # The Pallas materialized-copy variant (direct HBM->HBM DMA).
    y1 = identity_copy(x)
    jax.block_until_ready(y1)
    assert y1.shape == (B, S, H) and y1.dtype == jnp.float32
    assert (jax.device_get(y1) == x_host).all()

    # 2) A slightly larger input that crosses the chunking threshold,
    #    exercising the overlapped multi-DMA path (4 chunks x 0.5 MiB).
    key2 = jax.random.PRNGKey(1)
    xl = jax.random.normal(key2, (4, 128, 1024), dtype=jnp.float32)  # 2 MiB
    xl_host = jax.device_get(xl)
    yl = identity_copy(xl)
    jax.block_until_ready(yl)
    assert yl.shape == xl.shape and yl.dtype == xl.dtype
    assert (jax.device_get(yl) == xl_host).all()

    assert identity_map_config() == {"mm_projector_type": "identity"}
    print("KERNEL_OK")
</pallas_src>

<mosaic_0001>
module attributes {stable_mosaic.version = 11 : i64} {
  func.func @kernel(%arg0: memref<2x8x32xf32, #tpu.memory_space<any>>, %arg1: memref<2x8x32xf32, #tpu.memory_space<any>>, %arg2: memref<1x!tpu.dma_semaphore, #tpu.memory_space<semaphore_mem>>) attributes {dimension_semantics = [], scalar_prefetch = 0 : i64, scratch_operands = 1 : i64, tpu.core_type = #tpu.core_type<tc>} {
    %c0_i32 = arith.constant 0 : i32
    %0 = tpu.memref_slice %arg2[%c0_i32] : memref<1x!tpu.dma_semaphore, #tpu.memory_space<semaphore_mem>> -> memref<1x!tpu.dma_semaphore, #tpu.memory_space<semaphore_mem>>
    %1 = tpu.memref_squeeze %0 : memref<1x!tpu.dma_semaphore, #tpu.memory_space<semaphore_mem>> -> memref<!tpu.dma_semaphore, #tpu.memory_space<semaphore_mem>>
    tpu.enqueue_dma source(%arg0 : memref<2x8x32xf32, #tpu.memory_space<any>>) target(%arg1 : memref<2x8x32xf32, #tpu.memory_space<any>>) target_semaphore(%1 : memref<!tpu.dma_semaphore, #tpu.memory_space<semaphore_mem>>)
    %c0_i32_0 = arith.constant 0 : i32
    %2 = tpu.memref_slice %arg2[%c0_i32_0] : memref<1x!tpu.dma_semaphore, #tpu.memory_space<semaphore_mem>> -> memref<1x!tpu.dma_semaphore, #tpu.memory_space<semaphore_mem>>
    %3 = tpu.memref_squeeze %2 : memref<1x!tpu.dma_semaphore, #tpu.memory_space<semaphore_mem>> -> memref<!tpu.dma_semaphore, #tpu.memory_space<semaphore_mem>>
    tpu.wait_dma2 semaphore(%3 : memref<!tpu.dma_semaphore, #tpu.memory_space<semaphore_mem>>) src(%arg0 : memref<2x8x32xf32, #tpu.memory_space<any>>) dst(%arg1 : memref<2x8x32xf32, #tpu.memory_space<any>>)
    return
  }
}

</mosaic_0001>

<bundles_post_ra>
// kernel: tpu_custom_call.1
= control target key start
LH: loop header
LB: loop body
LE: loop exit
PB: predicated region body
PF: predicated region fallthrough
CT: control target
= control target key end

     0   :  { %s35_s6 = smov [#allocation2]   ;;  %s36_s7 = smov [#allocation3]   ;;  %s54_s0 = inlined_call_operand.hbm [shape: f32[2,8,32], index: 0, kind: input, shape index: {}]   ;;  %s55_s1 = inlined_call_operand.hbm [shape: f32[2,8,32], index: 1, kind: output, shape index: {}]  }
   0x1   :  { %s37_s8 = smov 0  }
   0x2   :  { %18 = dma.general %s54_s0, 256, %s55_s1, %s35_s6, %s36_s7, [#allocation4], %s37_s8, 0  }
   0x3   :  { %33 = dma.done.wait [#allocation2], 256 }
   0x4   :  { %34 = vsyncadd [#allocation2], 4294967040 }
   0x5   :  { %23 = vsyncmov [#allocation2] }
   0x8   :  { %s24_s13 = vpop.sfrf %23 }
   0x9   :  { %p29_p0 = scmp.ne.s32.totalorder %s24_s13, 0 }
   0xb   :  { %28 = shalt.err (%p29_p0)  }

</bundles_post_ra>
